<compile_context>
chip_gen: v6e
topology: v6e:2x2x1
jax: 0.10.0
libtpu: 0.0.40
codegen_flags: <defaults>
</compile_context>

<pallas_src>
import jax
import jax.numpy as jnp
from jax.experimental import pallas as pl
from jax.experimental.pallas import tpu as pltpu


def _cdiv(a, b):
    return -(-a // b)


def _round_up(n, m):
    return ((n + m - 1) // m) * m


def _pick_vmem_limit_bytes():
    """Generation-aware scoped-VMEM limit (~3/4 of physical, capped at 96 MiB)."""
    try:
        cap = int(pltpu.get_tpu_info().vmem_capacity_bytes)
    except Exception:
        cap = 128 * 1024 * 1024  # assume v5e/v6e-class if query unavailable
    return min(96 * 1024 * 1024, (cap * 3) // 4)


def _choose_tiling(B, block_rows, vmem_limit_bytes):
    """Balanced batch tiles: padding < 8*nb rows; tb capped by VMEM budget."""
    # Conservative ~4 KiB/row VMEM estimate: x/out double-buffered blocks are
    # lane-padded D=32 -> 128 and C=16 -> 128, plus f32 intermediates.
    vmem_cap_rows = max(512, ((vmem_limit_bytes // 4096) // 8) * 8)
    block_rows = max(8, min(block_rows, vmem_cap_rows))
    nb = max(1, _cdiv(B, block_rows))
    # Keep >= 2 grid steps for nontrivial batches: enables DMA/compute overlap
    # and lets dimension_semantics=("parallel",) split across v7x's 2 TCs.
    if nb < 2 and B >= 1024:
        nb = 2
    tb = _round_up(_cdiv(B, nb), 8)
    return tb, nb


def mlp_layernorm_kernel(x_ref, w1_ref, b1_ref, w2_ref, b2_ref,
                         wo_ref, bo_ref, g_ref, beta_ref, o_ref):
    # Layer 1: Linear (bf16 MXU, f32 accumulate) + bias + ReLU
    x = x_ref[...].astype(jnp.bfloat16)  # no-op if caller already passes bf16
    h = jnp.dot(x, w1_ref[...],
                preferred_element_type=jnp.float32) + b1_ref[...]
    h = jnp.maximum(h, 0.0)
    # Layer 2: Linear + bias + ReLU
    h = jnp.dot(h.astype(jnp.bfloat16), w2_ref[...],
                preferred_element_type=jnp.float32) + b2_ref[...]
    h = jnp.maximum(h, 0.0)
    # Output projection
    y = jnp.dot(h.astype(jnp.bfloat16), wo_ref[...],
                preferred_element_type=jnp.float32) + bo_ref[...]
    # LayerNorm over the last (n_components) axis, eps = 1e-5 (PyTorch default)
    mean = jnp.mean(y, axis=-1, keepdims=True)
    var = jnp.mean((y - mean) * (y - mean), axis=-1, keepdims=True)
    y_hat = (y - mean) * jax.lax.rsqrt(var + 1e-5)
    o_ref[...] = (y_hat * g_ref[...] + beta_ref[...]).astype(o_ref.dtype)


def inference_network_forward(x, params, *, block_rows=8192,
                              out_dtype=jnp.float32):
    """Fused MLP + LayerNorm forward, tiled over the batch dimension.

    x may be f32 or bf16 (bf16 cuts ~2/3 of the HBM read bytes); out_dtype may
    be jnp.bfloat16 to cut the write bytes as well.
    """
    (w1, b1, w2, b2, wo, bo, gamma, beta) = params
    B, D = x.shape
    C = wo.shape[1]

    vmem_limit_bytes = _pick_vmem_limit_bytes()
    tb, nb = _choose_tiling(B, block_rows, vmem_limit_bytes)
    B_pad = nb * tb
    if B_pad != B:
        x = jnp.pad(x, ((0, B_pad - B), (0, 0)))

    def const_spec(arr):
        shape = arr.shape
        return pl.BlockSpec(shape, lambda i: (0,) * len(shape))

    flops = 2 * B_pad * (w1.shape[0] * w1.shape[1]
                         + w2.shape[0] * w2.shape[1]
                         + wo.shape[0] * wo.shape[1])
    weight_bytes = sum(int(a.size) * a.dtype.itemsize for a in params)
    out_itemsize = jnp.dtype(out_dtype).itemsize
    bytes_accessed = int(B_pad * D * x.dtype.itemsize
                         + B_pad * C * out_itemsize + weight_bytes)

    out = pl.pallas_call(
        mlp_layernorm_kernel,
        out_shape=jax.ShapeDtypeStruct((B_pad, C), out_dtype),
        grid=(nb,),
        in_specs=[
            pl.BlockSpec((tb, D), lambda i: (i, 0)),     # x: tiled over rows
            const_spec(w1), const_spec(b1),              # weights: resident
            const_spec(w2), const_spec(b2),
            const_spec(wo), const_spec(bo),
            const_spec(gamma), const_spec(beta),
        ],
        out_specs=pl.BlockSpec((tb, C), lambda i: (i, 0)),
        compiler_params=pltpu.CompilerParams(
            dimension_semantics=("parallel",),
            vmem_limit_bytes=vmem_limit_bytes),
        cost_estimate=pl.CostEstimate(
            flops=flops, transcendentals=B_pad,
            bytes_accessed=bytes_accessed),
    )(x, w1, b1, w2, b2, wo, bo, gamma, beta)

    return out[:B] if B_pad != B else out


def init_params(key, true_input_size, hiddens, n_components):
    """Deterministic parameter init mimicking nn.Linear defaults (uniform).

    Weight matrices are stored in bf16 (MXU-native, halves their HBM bytes);
    biases and LayerNorm affine parameters stay f32.
    """
    keys = jax.random.split(key, 6)
    dims = [true_input_size] + list(hiddens)
    params = []
    # hidden linears
    for i, (din, dout) in enumerate(zip(dims[:-1], dims[1:])):
        bound = 1.0 / jnp.sqrt(din)
        w = jax.random.uniform(keys[2 * i], (din, dout), jnp.float32,
                               -bound, bound).astype(jnp.bfloat16)
        b = jax.random.uniform(keys[2 * i + 1], (1, dout), jnp.float32,
                               -bound, bound)
        params.extend([w, b])
    # output linear
    din, dout = dims[-1], n_components
    bound = 1.0 / jnp.sqrt(din)
    wo = jax.random.uniform(keys[4], (din, dout), jnp.float32,
                            -bound, bound).astype(jnp.bfloat16)
    bo = jax.random.uniform(keys[5], (1, dout), jnp.float32, -bound, bound)
    params.extend([wo, bo])
    # LayerNorm affine params (PyTorch default init: gamma=1, beta=0)
    params.append(jnp.ones((1, n_components), jnp.float32))
    params.append(jnp.zeros((1, n_components), jnp.float32))
    return tuple(params)


def reference_forward(x, params):
    """Plain-JAX reference (same bf16-matmul / f32-accumulate math)."""
    (w1, b1, w2, b2, wo, bo, gamma, beta) = params
    h = jnp.dot(x.astype(jnp.bfloat16), w1,
                preferred_element_type=jnp.float32) + b1
    h = jnp.maximum(h, 0.0)
    h = jnp.dot(h.astype(jnp.bfloat16), w2,
                preferred_element_type=jnp.float32) + b2
    h = jnp.maximum(h, 0.0)
    y = jnp.dot(h.astype(jnp.bfloat16), wo,
                preferred_element_type=jnp.float32) + bo
    mean = jnp.mean(y, axis=-1, keepdims=True)
    var = jnp.mean((y - mean) ** 2, axis=-1, keepdims=True)
    return (y - mean) * jax.lax.rsqrt(var + 1e-5) * gamma + beta


if __name__ == "__main__":
    # Small config consistent with the module's forward:
    # true_input_size=32, hiddens=[64, 32], n_components=16,
    # activation=ReLU, inference_dropout (eval -> identity),
    # output_normalization='layer', affine=True.
    D_IN, HIDDENS, N_COMP = 32, (64, 32), 16

    key = jax.random.PRNGKey(0)
    k_x1, k_x2, k_x3, k_p = jax.random.split(key, 4)
    params = init_params(k_p, D_IN, HIDDENS, N_COMP)

    # Case 1: toy batch (single grid step, f32 in / f32 out).
    B1 = 8
    x1 = jax.random.normal(k_x1, (B1, D_IN), jnp.float32)
    out1 = jax.block_until_ready(inference_network_forward(x1, params))
    ref1 = reference_forward(x1, params)
    assert out1.shape == (B1, N_COMP) and out1.dtype == jnp.float32
    assert jnp.allclose(out1, ref1, atol=2e-3, rtol=2e-3)

    # Case 2: non-multiple batch with a small tile -> exercises the balanced
    # batch grid (multiple pipelined steps) and the row-padding/un-padding path.
    B2 = 200
    x2 = jax.random.normal(k_x2, (B2, D_IN), jnp.float32)
    out2 = jax.block_until_ready(
        inference_network_forward(x2, params, block_rows=64))
    ref2 = reference_forward(x2, params)
    assert out2.shape == (B2, N_COMP)
    assert jnp.allclose(out2, ref2, atol=2e-3, rtol=2e-3)

    # Case 3: bf16 input + bf16 output (reduced-HBM-traffic path).
    B3 = 96
    x3 = jax.random.normal(k_x3, (B3, D_IN), jnp.float32).astype(jnp.bfloat16)
    out3 = jax.block_until_ready(
        inference_network_forward(x3, params, block_rows=32,
                                  out_dtype=jnp.bfloat16))
    ref3 = reference_forward(x3.astype(jnp.float32), params)
    assert out3.shape == (B3, N_COMP) and out3.dtype == jnp.bfloat16
    assert jnp.allclose(out3.astype(jnp.float32), ref3, atol=3e-2, rtol=3e-2)

    print("KERNEL_OK")
</pallas_src>

<mosaic_0001>
module attributes {stable_mosaic.version = 11 : i64} {
  func.func @mlp_layernorm_kernel(%arg0: i32, %arg1: memref<8x32xf32, #tpu.memory_space<vmem>>, %arg2: memref<32x64xbf16, #tpu.memory_space<vmem>>, %arg3: memref<1x64xf32, #tpu.memory_space<vmem>>, %arg4: memref<64x32xbf16, #tpu.memory_space<vmem>>, %arg5: memref<1x32xf32, #tpu.memory_space<vmem>>, %arg6: memref<32x16xbf16, #tpu.memory_space<vmem>>, %arg7: memref<1x16xf32, #tpu.memory_space<vmem>>, %arg8: memref<1x16xf32, #tpu.memory_space<vmem>>, %arg9: memref<1x16xf32, #tpu.memory_space<vmem>>, %arg10: memref<8x16xf32, #tpu.memory_space<vmem>>) attributes {dimension_semantics = [#tpu.dimension_semantics<parallel>], iteration_bounds = array<i64: 1>, scalar_prefetch = 0 : i64, scratch_operands = 0 : i64, tpu.core_type = #tpu.core_type<tc>, window_params = [{transform_indices = @transform_0, window_bounds = array<i64: 8, 32>}, {pipeline_mode = #tpu.pipeline_mode<synchronous>, transform_indices = @transform_1, window_bounds = array<i64: 32, 64>}, {pipeline_mode = #tpu.pipeline_mode<synchronous>, transform_indices = @transform_2, window_bounds = array<i64: 1, 64>}, {pipeline_mode = #tpu.pipeline_mode<synchronous>, transform_indices = @transform_3, window_bounds = array<i64: 64, 32>}, {pipeline_mode = #tpu.pipeline_mode<synchronous>, transform_indices = @transform_4, window_bounds = array<i64: 1, 32>}, {pipeline_mode = #tpu.pipeline_mode<synchronous>, transform_indices = @transform_5, window_bounds = array<i64: 32, 16>}, {pipeline_mode = #tpu.pipeline_mode<synchronous>, transform_indices = @transform_6, window_bounds = array<i64: 1, 16>}, {pipeline_mode = #tpu.pipeline_mode<synchronous>, transform_indices = @transform_7, window_bounds = array<i64: 1, 16>}, {pipeline_mode = #tpu.pipeline_mode<synchronous>, transform_indices = @transform_8, window_bounds = array<i64: 1, 16>}, {transform_indices = @transform_9, window_bounds = array<i64: 8, 16>}]} {
    %c0 = arith.constant 0 : index
    %c0_0 = arith.constant 0 : index
    %0 = vector.load %arg1[%c0, %c0_0] : memref<8x32xf32, #tpu.memory_space<vmem>>, vector<8x32xf32>
    %1 = arith.truncf %0 : vector<8x32xf32> to vector<8x32xbf16>
    %c0_1 = arith.constant 0 : index
    %c0_2 = arith.constant 0 : index
    %2 = vector.load %arg2[%c0_1, %c0_2] : memref<32x64xbf16, #tpu.memory_space<vmem>>, vector<32x64xbf16>
    %cst = arith.constant dense<0.000000e+00> : vector<8x64xf32>
    %3 = tpu.matmul %1, %2, %cst {dimension_numbers = #tpu.dot_dimension_numbers<[1], [0], [0], [1], [0, 0, 1, 1], [], []>} : vector<8x32xbf16>, vector<32x64xbf16>, vector<8x64xf32> -> vector<8x64xf32>
    %c0_3 = arith.constant 0 : index
    %c0_4 = arith.constant 0 : index
    %4 = vector.load %arg3[%c0_3, %c0_4] : memref<1x64xf32, #tpu.memory_space<vmem>>, vector<1x64xf32>
    %5 = vector.broadcast %4 : vector<1x64xf32> to vector<8x64xf32>
    %6 = arith.addf %3, %5 : vector<8x64xf32>
    %cst_5 = arith.constant 0.000000e+00 : f32
    %7 = vector.broadcast %cst_5 : f32 to vector<8x64xf32>
    %8 = arith.maximumf %6, %7 : vector<8x64xf32>
    %9 = arith.truncf %8 : vector<8x64xf32> to vector<8x64xbf16>
    %c0_6 = arith.constant 0 : index
    %c0_7 = arith.constant 0 : index
    %10 = vector.load %arg4[%c0_6, %c0_7] : memref<64x32xbf16, #tpu.memory_space<vmem>>, vector<64x32xbf16>
    %cst_8 = arith.constant dense<0.000000e+00> : vector<8x32xf32>
    %11 = tpu.matmul %9, %10, %cst_8 {dimension_numbers = #tpu.dot_dimension_numbers<[1], [0], [0], [1], [0, 0, 1, 1], [], []>} : vector<8x64xbf16>, vector<64x32xbf16>, vector<8x32xf32> -> vector<8x32xf32>
    %c0_9 = arith.constant 0 : index
    %c0_10 = arith.constant 0 : index
    %12 = vector.load %arg5[%c0_9, %c0_10] : memref<1x32xf32, #tpu.memory_space<vmem>>, vector<1x32xf32>
    %13 = vector.broadcast %12 : vector<1x32xf32> to vector<8x32xf32>
    %14 = arith.addf %11, %13 : vector<8x32xf32>
    %cst_11 = arith.constant 0.000000e+00 : f32
    %15 = vector.broadcast %cst_11 : f32 to vector<8x32xf32>
    %16 = arith.maximumf %14, %15 : vector<8x32xf32>
    %17 = arith.truncf %16 : vector<8x32xf32> to vector<8x32xbf16>
    %c0_12 = arith.constant 0 : index
    %c0_13 = arith.constant 0 : index
    %18 = vector.load %arg6[%c0_12, %c0_13] : memref<32x16xbf16, #tpu.memory_space<vmem>>, vector<32x16xbf16>
    %cst_14 = arith.constant dense<0.000000e+00> : vector<8x16xf32>
    %19 = tpu.matmul %17, %18, %cst_14 {dimension_numbers = #tpu.dot_dimension_numbers<[1], [0], [0], [1], [0, 0, 1, 1], [], []>} : vector<8x32xbf16>, vector<32x16xbf16>, vector<8x16xf32> -> vector<8x16xf32>
    %c0_15 = arith.constant 0 : index
    %c0_16 = arith.constant 0 : index
    %20 = vector.load %arg7[%c0_15, %c0_16] : memref<1x16xf32, #tpu.memory_space<vmem>>, vector<1x16xf32>
    %21 = vector.broadcast %20 : vector<1x16xf32> to vector<8x16xf32>
    %22 = arith.addf %19, %21 : vector<8x16xf32>
    %cst_17 = arith.constant dense<0.000000e+00> : vector<8xf32>
    %23 = vector.multi_reduction <add>, %22, %cst_17 [1] : vector<8x16xf32> to vector<8xf32>
    %24 = vector.shape_cast %23 : vector<8xf32> to vector<8x1xf32>
    %cst_18 = arith.constant 1.600000e+01 : f32
    %25 = vector.broadcast %cst_18 : f32 to vector<8x1xf32>
    %26 = arith.divf %24, %25 : vector<8x1xf32>
    %27 = vector.broadcast %26 : vector<8x1xf32> to vector<8x16xf32>
    %28 = arith.subf %22, %27 : vector<8x16xf32>
    %29 = vector.broadcast %26 : vector<8x1xf32> to vector<8x16xf32>
    %30 = arith.subf %22, %29 : vector<8x16xf32>
    %31 = arith.mulf %28, %30 : vector<8x16xf32>
    %cst_19 = arith.constant dense<0.000000e+00> : vector<8xf32>
    %32 = vector.multi_reduction <add>, %31, %cst_19 [1] : vector<8x16xf32> to vector<8xf32>
    %33 = vector.shape_cast %32 : vector<8xf32> to vector<8x1xf32>
    %cst_20 = arith.constant 1.600000e+01 : f32
    %34 = vector.broadcast %cst_20 : f32 to vector<8x1xf32>
    %35 = arith.divf %33, %34 : vector<8x1xf32>
    %36 = vector.broadcast %26 : vector<8x1xf32> to vector<8x16xf32>
    %37 = arith.subf %22, %36 : vector<8x16xf32>
    %cst_21 = arith.constant 9.99999974E-6 : f32
    %38 = vector.broadcast %cst_21 : f32 to vector<8x1xf32>
    %39 = arith.addf %35, %38 : vector<8x1xf32>
    %40 = math.rsqrt %39 : vector<8x1xf32>
    %41 = vector.broadcast %40 : vector<8x1xf32> to vector<8x16xf32>
    %42 = arith.mulf %37, %41 : vector<8x16xf32>
    %c0_22 = arith.constant 0 : index
    %c0_23 = arith.constant 0 : index
    %43 = vector.load %arg8[%c0_22, %c0_23] : memref<1x16xf32, #tpu.memory_space<vmem>>, vector<1x16xf32>
    %44 = vector.broadcast %43 : vector<1x16xf32> to vector<8x16xf32>
    %45 = arith.mulf %42, %44 : vector<8x16xf32>
    %c0_24 = arith.constant 0 : index
    %c0_25 = arith.constant 0 : index
    %46 = vector.load %arg9[%c0_24, %c0_25] : memref<1x16xf32, #tpu.memory_space<vmem>>, vector<1x16xf32>
    %47 = vector.broadcast %46 : vector<1x16xf32> to vector<8x16xf32>
    %48 = arith.addf %45, %47 : vector<8x16xf32>
    %c0_26 = arith.constant 0 : index
    %c0_27 = arith.constant 0 : index
    %49 = vector.load %arg10[%c0_26, %c0_27] : memref<8x16xf32, #tpu.memory_space<vmem>>, vector<8x16xf32>
    tpu.vector_store %arg10[%c0_26, %c0_27], %48 {strides = array<i32>} : memref<8x16xf32, #tpu.memory_space<vmem>>, vector<8x16xf32>,
    return
  }
  func.func @transform_0(%arg0: i32) -> (i32, i32) {
    %c0_i32 = arith.constant 0 : i32
    %c0_i32_0 = arith.constant 0 : i32
    return %arg0, %c0_i32 : i32, i32
  }
  func.func @transform_1(%arg0: i32) -> (i32, i32) {
    %c0_i32 = arith.constant 0 : i32
    %c0_i32_0 = arith.constant 0 : i32
    %c0_i32_1 = arith.constant 0 : i32
    return %c0_i32, %c0_i32_0 : i32, i32
  }
  func.func @transform_2(%arg0: i32) -> (i32, i32) {
    %c0_i32 = arith.constant 0 : i32
    %c0_i32_0 = arith.constant 0 : i32
    %c0_i32_1 = arith.constant 0 : i32
    return %c0_i32, %c0_i32_0 : i32, i32
  }
  func.func @transform_3(%arg0: i32) -> (i32, i32) {
    %c0_i32 = arith.constant 0 : i32
    %c0_i32_0 = arith.constant 0 : i32
    %c0_i32_1 = arith.constant 0 : i32
    return %c0_i32, %c0_i32_0 : i32, i32
  }
  func.func @transform_4(%arg0: i32) -> (i32, i32) {
    %c0_i32 = arith.constant 0 : i32
    %c0_i32_0 = arith.constant 0 : i32
    %c0_i32_1 = arith.constant 0 : i32
    return %c0_i32, %c0_i32_0 : i32, i32
  }
  func.func @transform_5(%arg0: i32) -> (i32, i32) {
    %c0_i32 = arith.constant 0 : i32
    %c0_i32_0 = arith.constant 0 : i32
    %c0_i32_1 = arith.constant 0 : i32
    return %c0_i32, %c0_i32_0 : i32, i32
  }
  func.func @transform_6(%arg0: i32) -> (i32, i32) {
    %c0_i32 = arith.constant 0 : i32
    %c0_i32_0 = arith.constant 0 : i32
    %c0_i32_1 = arith.constant 0 : i32
    return %c0_i32, %c0_i32_0 : i32, i32
  }
  func.func @transform_7(%arg0: i32) -> (i32, i32) {
    %c0_i32 = arith.constant 0 : i32
    %c0_i32_0 = arith.constant 0 : i32
    %c0_i32_1 = arith.constant 0 : i32
    return %c0_i32, %c0_i32_0 : i32, i32
  }
  func.func @transform_8(%arg0: i32) -> (i32, i32) {
    %c0_i32 = arith.constant 0 : i32
    %c0_i32_0 = arith.constant 0 : i32
    %c0_i32_1 = arith.constant 0 : i32
    return %c0_i32, %c0_i32_0 : i32, i32
  }
  func.func @transform_9(%arg0: i32) -> (i32, i32) {
    %c0_i32 = arith.constant 0 : i32
    %c0_i32_0 = arith.constant 0 : i32
    return %arg0, %c0_i32 : i32, i32
  }
}

</mosaic_0001>

<bundles_post_ra>
// kernel: tpu_custom_call.1
= control target key start
LH: loop header
LB: loop body
LE: loop exit
PB: predicated region body
PF: predicated region fallthrough
CT: control target
= control target key end

     0   :  { %v392_v1 = vmov 0.0   ;;  %vm393_vm0 = vmmov 0   ;;  %vm59_vm1 = vcmask 261120   ;;  %s498_s0 = inlined_call_operand.vmem [shape: f32[8,32], index: 0, kind: input, shape index: {}]   ;;  %s499_s1 = inlined_call_operand.vmem [shape: bf16[32,64], index: 1, kind: input, shape index: {}]   ;;  %s500_s2 = inlined_call_operand.vmem [shape: f32[1,64], index: 2, kind: input, shape index: {}]   ;;  %s501_s3 = inlined_call_operand.vmem [shape: bf16[64,32], index: 3, kind: input, shape index: {}]   ;;  %s502_s4 = inlined_call_operand.vmem [shape: f32[1,32], index: 4, kind: input, shape index: {}]   ;;  %s503_s5 = inlined_call_operand.vmem [shape: bf16[32,16], index: 5, kind: input, shape index: {}]   ;;  %s504_s6 = inlined_call_operand.vmem [shape: f32[1,16], index: 6, kind: input, shape index: {}]   ;;  %s505_s7 = inlined_call_operand.vmem [shape: f32[1,16], index: 7, kind: input, shape index: {}]   ;;  %s506_s8 = inlined_call_operand.vmem [shape: f32[1,16], index: 8, kind: input, shape index: {}]   ;;  %s507_s9 = inlined_call_operand.hbm [shape: f32[8,16], index: 9, kind: output, shape index: {}]  }
   0x1   :  { %v360_v0 = vld [vmem:[%s499_s1 + $0x8] sm:$0xff]   ;;  %329 = vmatprep.subr.bf16.mxu0 %v392_v1  ;;  %v361_v2 = vld [vmem:[%s499_s1] sm:$0xff]   ;;  %337 = vmatprep.subr.bf16.mxu1 %v392_v1  ;;  %v362_v4 = vld [vmem:[%s501_s3 + $0x18] sm:$0xff]  }
   0x2   :  { %330 = vmatpush3.bf16.msra.mxu0 %v360_v0  ;;  %333 = vmatprep.mubr.msk.bf16.mxu0 %vm393_vm0, %v392_v1  ;;  %v34_v3 = vld [vmem:[%s498_s0] sm:$0xff]  ;;  %v363_v5 = vld [vmem:[%s501_s3 + $0x10] sm:$0xff]  }
   0x3   :  { %331 = vmatprep.subr.bf16.mxu0 %v392_v1  ;;  %345 = vmatprep.mubr.msk.bf16.mxu1 %vm393_vm0, %v392_v1  ;;  %v35_v6 = vpack.c.bf16 %v34_v3, %v34_v3 }
   0x4   :  { %338 = vmatpush3.bf16.msra.mxu1 %v362_v4 }
   0x5   :  { %339 = vmatprep.subr.bf16.mxu1 %v392_v1 }
   0x6   :  { %332 = vmatpush3.bf16.msra.mxu0 %v361_v2 }
   0x7   :  { %349 = vmatprep.subr.bf16.mxu0 %v392_v1 }
   0x8   :  { %14 = vsyncpa [#allocation3], 0  ;;  %340 = vmatpush3.bf16.msra.mxu1 %v363_v5  ;;  %v364_v7 = vld [vmem:[%s501_s3 + $0x8] sm:$0xff]   ;;  %v365_v8 = vld [vmem:[%s501_s3] sm:$0xff]   ;;  %vm144_vm2 = vcmask 523264   ;;  %vm256_vm3 = vcmask 130048  }
   0x9   :  { %334 = vmatmul.mubr.msk.bf16.vlgmr.msra.gmra.mxu0 %vm59_vm1, %v35_v6  ;;  %341 = vmatprep.subr.bf16.mxu1 %v392_v1  ;;  %v366_v9 = vld [vmem:[%s503_s5 + $0x8] sm:$0xff]   ;;  %v302_v10 = vld [vmem:[%s500_s2] ss:$0 sm:$0xff]  ;;  %s394_s30 = smov [#allocation2]  }
   0xa   :  { %353 = vmatprep.mubr.msk.bf16.mxu0 %vm393_vm0, %v392_v1  ;;  %350 = vmatpush3.bf16.msra.mxu0 %v366_v9  ;;  %v367_v18 = vld [vmem:[%s503_s5] sm:$0xff]   ;;  %s294_s10 = sshll.u32 %s394_s30, 4  ;;  %s295_s10 = int_to_ptr.vmem [resolvable:$true] %s294_s10 }
   0xb   :  { %351 = vmatprep.subr.bf16.mxu0 %v392_v1  ;;  %v306_v19 = vld [vmem:[%s502_s4] ss:$0 sm:$0xff]  ;;  %s370_s11 = scalar_lea.vmem %s295_s10, 128  ;;  %p375_p1 = scmp.lt.s32.totalorder %s295_s10, %s295_s10 }
   0xc   :  { %342 = vmatpush3.bf16.msra.mxu1 %v364_v7  ;;  %v312_v27 = vld [vmem:[%s504_s6] ss:$0 sm:$0xff]  ;;  %p371_p0 = scmp.ne.s32.totalorder %s295_s10, %s370_s11  ;;  %p376_p2 = scmp.lt.s32.totalorder %s370_s11, %s370_s11 }
   0xd   :  { %343 = vmatprep.subr.bf16.mxu1 %v392_v1  ;;  %v316_v43 = vld [vmem:[%s505_s7] ss:$0 sm:$0xff] }
   0xe   :  { %352 = vmatpush3.bf16.msra.mxu0 %v367_v18  ;;  %v317_v45 = vld [vmem:[%s506_s8] ss:$0 sm:$0xff]  ;;  %p377_p3 = por %p376_p2, %p375_p1 }
  0x10   :  { %344 = vmatpush3.bf16.msra.mxu1 %v365_v8  ;;  %p378_p4 = pnand %p377_p3, %p371_p0 }
  0xc9   :  { %v97_v11 = vpop.f32.mrf.mxu0 }
  0xca   :  { %v98_v12 = vadd.f32 %v302_v10, %v97_v11 }
  0xcb   :  { %v335_v13 = vpop.f32.mrf.mxu0 }
  0xcc   :  { %v103_v14 = vmax.f32 %v98_v12, 0.0 }
  0xcd   :  { %v100_v15 = vpop.f32.mrf.mxu0 }
  0xce   :  { %v104_v16 = vpack.c.bf16 %v103_v14, %v103_v14 }
  0xcf   :  { %v336_v17 = vpop.f32.mrf.mxu0 }
  0xd0   :  { %346 = vmatmul.mubr.msk.bf16.vlgmr.msra.gmra.mxu1 %vm144_vm2, %v104_v16 }
 0x190   :  { %v182_v20 = vpop.f32.mrf.mxu1 }
 0x191   :  { %v183_v21 = vadd.f32 %v306_v19, %v182_v20 }
 0x192   :  { %v347_v22 = vpop.f32.mrf.mxu1 }
 0x193   :  { %v188_v23 = vmax.f32 %v183_v21, 0.0 }
 0x194   :  { %v185_v24 = vpop.f32.mrf.mxu1 }
 0x195   :  { %v189_v25 = vpack.c.bf16 %v188_v23, %v188_v23 }
 0x196   :  { %v348_v26 = vpop.f32.mrf.mxu1 }
 0x197   :  { %354 = vmatmul.mubr.msk.bf16.vlgmr.msra.gmra.mxu0 %vm59_vm1, %v189_v25 }
 0x257   :  { %v250_v28 = vpop.f32.mrf.mxu0 }
 0x258   :  { %v251_v29 = vadd.f32 %v312_v27, %v250_v28 }
 0x259   :  { %v355_v30 = vpop.f32.mrf.mxu0 }
 0x25a   :  { %v257_v31 = vsel %vm256_vm3, %v251_v29, 0.0 }
 0x25b   :  { %258 = vadd.xlane.f32.xlu0 %v257_v31  ;;  %v253_v32 = vpop.f32.mrf.mxu0 }
 0x25d   :  { %v356_v33 = vpop.f32.mrf.mxu0 }
 0x2e4   :  { %v259_v34 = vpop.xlane.xlu0 %258 }
 0x2e5   :  { %v261_v35 = vmul.f32 0.0625, %v259_v34 }
 0x2e7   :  { %v262_v36 = vsub.f32 %v251_v29, %v261_v35 }
 0x2e9   :  { %v263_v37 = vmul.f32 %v262_v36, %v262_v36 }
 0x2eb   :  { %v264_v38 = vsel %vm256_vm3, %v263_v37, 0.0 }
 0x2ec   :  { %265 = vadd.xlane.f32.xlu0 %v264_v38 }
 0x375   :  { %v266_v39 = vpop.xlane.xlu0 %265 }
 0x376   :  { %v267_v40 = vmul.f32 0.0625, %v266_v39 }
 0x378   :  { %v268_v41 = vadd.f32 1e-05, %v267_v40 }
 0x37a   :  { %368 = vrsqrt.f32 %v268_v41 }
 0x387   :  { %v369_v42 = vpop.eup %368 }
 0x388   :  { %v270_v44 = vmul.f32 %v369_v42, %v262_v36 }
 0x38a   :  { %v278_v46 = vmul.f32 %v316_v43, %v270_v44 }
 0x38c   :  { %v286_v47 = vadd.f32 %v317_v45, %v278_v46 }
 0x38e   :  { %287 = vst.msk [vmem:[#allocation2] sm:$0xff] %vm256_vm3, %v286_v47 }
 0x38f   :  { %381 = shalt.err (!%p378_p4)
}
 0x390   :  { %297 = dma.vmem_to_hbm [thread:$0]  %s295_s10, 128, %s507_s9, [#allocation3]  }
 0x391   :  { %390 = dma.done.wait [#allocation3], 128  }
 0x392   :  { %391 = vsyncadd [#allocation3], 4294967168 }
 0x393   :  { %301 = vsyncpa [#allocation3], 1 }

</bundles_post_ra>
